<compile_context>
chip_gen: v6e
topology: v6e:2x2x1
jax: 0.10.0
libtpu: 0.0.40
codegen_flags: <defaults>
</compile_context>

<pallas_src>
import jax
import jax.numpy as jnp
from jax.experimental import pallas as pl
from jax.experimental.pallas import tpu as pltpu


def _round_up(x, m):
    return (x + m - 1) // m * m


def qnet_kernel(x_ref, w1_ref, w2_ref, w3_ref, ball_ref, out_ref):
    # x tile is [tm, state_dim]; weights are pre-transposed ([in, out]) so each
    # layer is a plain matmul in the natural [batch, features] orientation.
    hu = w1_ref.shape[1]
    action_dim = w3_ref.shape[1]

    x = x_ref[...]                                                      # [tm, state_dim]
    h = jnp.dot(x, w1_ref[...], preferred_element_type=jnp.float32)
    h = jnp.maximum(h + ball_ref[0:1, :hu], 0.0)                        # [tm, hu]
    h = jnp.dot(h, w2_ref[...], preferred_element_type=jnp.float32)
    h = jnp.maximum(h + ball_ref[1:2, :hu], 0.0)                        # [tm, hu]
    o = jnp.dot(h, w3_ref[...], preferred_element_type=jnp.float32)
    out_ref[...] = (o + ball_ref[2:3, :action_dim]).astype(out_ref.dtype)


def pack_params(w1, b1, w2, b2, w3, b3):
    """Convert PyTorch-layout params (w: [out, in], b: [out]) to kernel layout.

    Call ONCE at init time: weights are transposed to [in, out] and the three
    bias vectors are packed into a single [3, max(hu, action_dim)] buffer.
    """
    hu, action_dim = w1.shape[0], w3.shape[0]
    cols = max(hu, action_dim)
    pad = lambda b: jnp.pad(b, (0, cols - b.shape[0]))
    ball = jnp.stack([pad(b1), pad(b2), pad(b3)], axis=0)               # [3, cols]
    return (w1.T, w2.T, w3.T, ball)


def qnetwork_forward(x, packed, *, tm_max=4096, single_tile_batch=512):
    """QNetwork forward pass.

    x:      [batch, state_dim] float32
    packed: output of pack_params(...)
    returns [batch, action_dim] float32
    """
    w1t, w2t, w3t, ball = packed
    batch, state_dim = x.shape
    hu = w1t.shape[1]
    action_dim = w3t.shape[1]

    # Tile selection: one step for small batches (overhead-bound regime); for
    # large batches split into >=2 balanced 128-aligned tiles (dual-TC on v7x).
    # Total VMEM footprint is tiny (<1 MiB) on every generation.
    if batch <= single_tile_batch:
        tm = _round_up(batch, 8)
    else:
        tm = min(tm_max, _round_up(pl.cdiv(batch, 2), 128))
    b_pad = _round_up(batch, tm)
    grid = (b_pad // tm,)

    # Pad batch only if needed (no transpose, no full-array copy when aligned).
    x_in = x if b_pad == batch else jnp.pad(x, ((0, b_pad - batch), (0, 0)))

    # Weights/biases: full blocks, same block every grid step -> DMA'd once,
    # VMEM-resident for the whole pallas_call.
    resident = lambda a: pl.BlockSpec(a.shape, lambda j: (0, 0))

    flops = 2 * b_pad * (state_dim * hu + hu * hu + hu * action_dim)
    param_elems = w1t.size + w2t.size + w3t.size + ball.size
    bytes_accessed = 4 * (b_pad * state_dim + b_pad * action_dim + param_elems)

    out = pl.pallas_call(
        qnet_kernel,
        out_shape=jax.ShapeDtypeStruct((b_pad, action_dim), jnp.float32),
        grid=grid,
        in_specs=[
            pl.BlockSpec((tm, state_dim), lambda j: (j, 0)),            # x tile
            resident(w1t), resident(w2t), resident(w3t), resident(ball),
        ],
        out_specs=pl.BlockSpec((tm, action_dim), lambda j: (j, 0)),
        compiler_params=pltpu.CompilerParams(
            dimension_semantics=("parallel",)),   # batch tiles -> both TCs on v7x
        cost_estimate=pl.CostEstimate(
            flops=flops, transcendentals=0, bytes_accessed=bytes_accessed),
    )(x_in, w1t, w2t, w3t, ball)

    # Padded rows hold garbage (bias-only / junk inputs): slice them off.
    return out if b_pad == batch else out[:batch]


def init_linear(key, fan_in, fan_out):
    # Mimic PyTorch nn.Linear default init: U(-1/sqrt(fan_in), 1/sqrt(fan_in)).
    kw, kb = jax.random.split(key)
    bound = 1.0 / jnp.sqrt(jnp.float32(fan_in))
    w = jax.random.uniform(kw, (fan_out, fan_in), jnp.float32, -bound, bound)  # [out, in]
    b = jax.random.uniform(kb, (fan_out,), jnp.float32, -bound, bound)         # [out]
    return w, b


def reference_forward(x, params):
    w1, b1, w2, b2, w3, b3 = params
    h1 = jnp.maximum(x @ w1.T + b1, 0.0)
    h2 = jnp.maximum(h1 @ w2.T + b2, 0.0)
    return h2 @ w3.T + b3


if __name__ == "__main__":
    state_dim, action_dim, hu = 4, 2, 24

    key = jax.random.PRNGKey(0)
    kx, kx_big, k1, k2, k3 = jax.random.split(key, 5)

    w1, b1 = init_linear(k1, state_dim, hu)
    w2, b2 = init_linear(k2, hu, hu)
    w3, b3 = init_linear(k3, hu, action_dim)
    params = (w1, b1, w2, b2, w3, b3)
    packed = pack_params(*params)   # one-time weight transpose + bias packing

    fwd = jax.jit(lambda x: qnetwork_forward(x, packed))

    # Small case (matches the PyTorch module's typical per-env-step usage).
    # TODO(synk): at batch~2 a plain fused XLA matmul chain is strictly faster
    # than any kernel launch; kept on the kernel path here to exercise it.
    batch = 2
    x = jax.random.normal(kx, (batch, state_dim), jnp.float32)
    out = jax.block_until_ready(fwd(x))
    ref = reference_forward(x, params)
    assert out.shape == (batch, action_dim)
    assert jnp.allclose(out, ref, atol=1e-5, rtol=1e-5)

    # Larger batch: exercises the multi-tile batch grid (>=2 parallel steps).
    big_batch = 1000
    x_big = jax.random.normal(kx_big, (big_batch, state_dim), jnp.float32)
    out_big = jax.block_until_ready(fwd(x_big))
    ref_big = reference_forward(x_big, params)
    assert out_big.shape == (big_batch, action_dim)
    assert jnp.allclose(out_big, ref_big, atol=1e-5, rtol=1e-5)

    print("KERNEL_OK")
</pallas_src>

<mosaic_0001>
module attributes {stable_mosaic.version = 11 : i64} {
  func.func @qnet_kernel(%arg0: i32, %arg1: memref<8x4xf32, #tpu.memory_space<vmem>>, %arg2: memref<4x24xf32, #tpu.memory_space<vmem>>, %arg3: memref<24x24xf32, #tpu.memory_space<vmem>>, %arg4: memref<24x2xf32, #tpu.memory_space<vmem>>, %arg5: memref<3x24xf32, #tpu.memory_space<vmem>>, %arg6: memref<8x2xf32, #tpu.memory_space<vmem>>) attributes {dimension_semantics = [#tpu.dimension_semantics<parallel>], iteration_bounds = array<i64: 1>, scalar_prefetch = 0 : i64, scratch_operands = 0 : i64, tpu.core_type = #tpu.core_type<tc>, window_params = [{transform_indices = @transform_0, window_bounds = array<i64: 8, 4>}, {pipeline_mode = #tpu.pipeline_mode<synchronous>, transform_indices = @transform_1, window_bounds = array<i64: 4, 24>}, {pipeline_mode = #tpu.pipeline_mode<synchronous>, transform_indices = @transform_2, window_bounds = array<i64: 24, 24>}, {pipeline_mode = #tpu.pipeline_mode<synchronous>, transform_indices = @transform_3, window_bounds = array<i64: 24, 2>}, {pipeline_mode = #tpu.pipeline_mode<synchronous>, transform_indices = @transform_4, window_bounds = array<i64: 3, 24>}, {transform_indices = @transform_5, window_bounds = array<i64: 8, 2>}]} {
    %c0 = arith.constant 0 : index
    %c0_0 = arith.constant 0 : index
    %0 = vector.load %arg1[%c0, %c0_0] : memref<8x4xf32, #tpu.memory_space<vmem>>, vector<8x4xf32>
    %c0_1 = arith.constant 0 : index
    %c0_2 = arith.constant 0 : index
    %1 = vector.load %arg2[%c0_1, %c0_2] : memref<4x24xf32, #tpu.memory_space<vmem>>, vector<4x24xf32>
    %cst = arith.constant dense<0.000000e+00> : vector<8x24xf32>
    %2 = tpu.matmul %0, %1, %cst {dimension_numbers = #tpu.dot_dimension_numbers<[1], [0], [0], [1], [0, 0, 1, 1], [], []>} : vector<8x4xf32>, vector<4x24xf32>, vector<8x24xf32> -> vector<8x24xf32>
    %c0_3 = arith.constant 0 : index
    %c0_4 = arith.constant 0 : index
    %3 = vector.load %arg5[%c0_3, %c0_4] : memref<3x24xf32, #tpu.memory_space<vmem>>, vector<1x24xf32>
    %4 = vector.broadcast %3 : vector<1x24xf32> to vector<8x24xf32>
    %5 = arith.addf %2, %4 : vector<8x24xf32>
    %cst_5 = arith.constant 0.000000e+00 : f32
    %6 = vector.broadcast %cst_5 : f32 to vector<8x24xf32>
    %7 = arith.maximumf %5, %6 : vector<8x24xf32>
    %c0_6 = arith.constant 0 : index
    %c0_7 = arith.constant 0 : index
    %8 = vector.load %arg3[%c0_6, %c0_7] : memref<24x24xf32, #tpu.memory_space<vmem>>, vector<24x24xf32>
    %cst_8 = arith.constant dense<0.000000e+00> : vector<8x24xf32>
    %9 = tpu.matmul %7, %8, %cst_8 {dimension_numbers = #tpu.dot_dimension_numbers<[1], [0], [0], [1], [0, 0, 1, 1], [], []>} : vector<8x24xf32>, vector<24x24xf32>, vector<8x24xf32> -> vector<8x24xf32>
    %c1 = arith.constant 1 : index
    %c0_9 = arith.constant 0 : index
    %10 = vector.load %arg5[%c1, %c0_9] : memref<3x24xf32, #tpu.memory_space<vmem>>, vector<1x24xf32>
    %11 = vector.broadcast %10 : vector<1x24xf32> to vector<8x24xf32>
    %12 = arith.addf %9, %11 : vector<8x24xf32>
    %cst_10 = arith.constant 0.000000e+00 : f32
    %13 = vector.broadcast %cst_10 : f32 to vector<8x24xf32>
    %14 = arith.maximumf %12, %13 : vector<8x24xf32>
    %c0_11 = arith.constant 0 : index
    %c0_12 = arith.constant 0 : index
    %15 = vector.load %arg4[%c0_11, %c0_12] : memref<24x2xf32, #tpu.memory_space<vmem>>, vector<24x2xf32>
    %cst_13 = arith.constant dense<0.000000e+00> : vector<8x2xf32>
    %16 = tpu.matmul %14, %15, %cst_13 {dimension_numbers = #tpu.dot_dimension_numbers<[1], [0], [0], [1], [0, 0, 1, 1], [], []>} : vector<8x24xf32>, vector<24x2xf32>, vector<8x2xf32> -> vector<8x2xf32>
    %c2 = arith.constant 2 : index
    %c0_14 = arith.constant 0 : index
    %17 = vector.load %arg5[%c2, %c0_14] : memref<3x24xf32, #tpu.memory_space<vmem>>, vector<1x2xf32>
    %18 = vector.broadcast %17 : vector<1x2xf32> to vector<8x2xf32>
    %19 = arith.addf %16, %18 : vector<8x2xf32>
    %c0_15 = arith.constant 0 : index
    %c0_16 = arith.constant 0 : index
    %20 = vector.load %arg6[%c0_15, %c0_16] : memref<8x2xf32, #tpu.memory_space<vmem>>, vector<8x2xf32>
    tpu.vector_store %arg6[%c0_15, %c0_16], %19 {strides = array<i32>} : memref<8x2xf32, #tpu.memory_space<vmem>>, vector<8x2xf32>,
    return
  }
  func.func @transform_0(%arg0: i32) -> (i32, i32) {
    %c0_i32 = arith.constant 0 : i32
    %c0_i32_0 = arith.constant 0 : i32
    return %arg0, %c0_i32 : i32, i32
  }
  func.func @transform_1(%arg0: i32) -> (i32, i32) {
    %c0_i32 = arith.constant 0 : i32
    %c0_i32_0 = arith.constant 0 : i32
    %c0_i32_1 = arith.constant 0 : i32
    return %c0_i32, %c0_i32_0 : i32, i32
  }
  func.func @transform_2(%arg0: i32) -> (i32, i32) {
    %c0_i32 = arith.constant 0 : i32
    %c0_i32_0 = arith.constant 0 : i32
    %c0_i32_1 = arith.constant 0 : i32
    return %c0_i32, %c0_i32_0 : i32, i32
  }
  func.func @transform_3(%arg0: i32) -> (i32, i32) {
    %c0_i32 = arith.constant 0 : i32
    %c0_i32_0 = arith.constant 0 : i32
    %c0_i32_1 = arith.constant 0 : i32
    return %c0_i32, %c0_i32_0 : i32, i32
  }
  func.func @transform_4(%arg0: i32) -> (i32, i32) {
    %c0_i32 = arith.constant 0 : i32
    %c0_i32_0 = arith.constant 0 : i32
    %c0_i32_1 = arith.constant 0 : i32
    return %c0_i32, %c0_i32_0 : i32, i32
  }
  func.func @transform_5(%arg0: i32) -> (i32, i32) {
    %c0_i32 = arith.constant 0 : i32
    %c0_i32_0 = arith.constant 0 : i32
    return %arg0, %c0_i32 : i32, i32
  }
}

</mosaic_0001>

<bundles_post_ra>
// kernel: _lambda_.1
= control target key start
LH: loop header
LB: loop body
LE: loop exit
PB: predicated region body
PF: predicated region fallthrough
CT: control target
= control target key end

     0   :  { %10 = vsyncpa [#allocation3], 0  ;;  %s458_s0 = inlined_call_operand.vmem [shape: f32[8,4], index: 0, kind: input, shape index: {}]   ;;  %s459_s1 = inlined_call_operand.vmem [shape: f32[4,24], index: 1, kind: input, shape index: {}]   ;;  %s460_s2 = inlined_call_operand.hbm [shape: f32[24,24], index: 2, kind: input, shape index: {}]   ;;  %s461_s3 = inlined_call_operand.hbm [shape: f32[24,2], index: 3, kind: input, shape index: {}]   ;;  %s462_s4 = inlined_call_operand.vmem [shape: f32[3,24], index: 4, kind: input, shape index: {}]   ;;  %s463_s5 = inlined_call_operand.vmem [shape: f32[8,2], index: 5, kind: output, shape index: {}]  }
   0x1   :  { %11 = vsyncpa [#allocation5], 0  ;;  %s396_s18 = smov [#allocation2]  }
   0x2   :  { %s21_s19 = sshll.u32 %s396_s18, 4  ;;  %s22_s19 = int_to_ptr.vmem [resolvable:$true] %s21_s19 }
   0x3   :  { %s360_s20 = scalar_lea.vmem %s22_s19, 384  ;;  %p365_p1 = scmp.lt.s32.totalorder %s22_s19, %s22_s19 }
   0x4   :  { %p361_p0 = scmp.ne.s32.totalorder %s22_s19, %s360_s20  ;;  %p366_p2 = scmp.lt.s32.totalorder %s360_s20, %s360_s20 }
   0x6   :  { %p367_p3 = por %p366_p2, %p365_p1 }
   0x8   :  { %p368_p4 = pnand %p367_p3, %p361_p0 }
   0xa   :  { %371 = shalt.err (!%p368_p4)
}
   0xb   :  { %s397_s21 = smov 128   ;;  %s398_s22 = smov 8  }
   0xc   :  { %27 = dma.hbm_to_vmem [thread:$0]  %s460_s2, 384, %s22_s19, [#allocation3], %s397_s21, %s397_s21, %s398_s22  }
   0xd   :  { %s399_s25 = smov [#allocation4]  }
   0xe   :  { %s33_s26 = sshll.u32 %s399_s25, 4  ;;  %s34_s26 = int_to_ptr.vmem [resolvable:$true] %s33_s26 }
   0xf   :  { %s380_s27 = scalar_lea.vmem %s34_s26, 384  ;;  %p385_p6 = scmp.lt.s32.totalorder %s34_s26, %s34_s26 }
  0x10   :  { %p381_p5 = scmp.ne.s32.totalorder %s34_s26, %s380_s27  ;;  %p386_p7 = scmp.lt.s32.totalorder %s380_s27, %s380_s27 }
  0x12   :  { %p387_p8 = por %p386_p7, %p385_p6 }
  0x14   :  { %p388_p9 = pnand %p387_p8, %p381_p5 }
  0x16   :  { %391 = shalt.err (!%p388_p9)
}
  0x17   :  { %39 = dma.hbm_to_vmem [thread:$0]  %s461_s3, 384, %s34_s26, [#allocation5], %s397_s21, %s397_s21, %s398_s22  }
  0x18   :  { %392 = dma.done.wait [#allocation3], 384  }
  0x19   :  { %393 = vsyncadd [#allocation3], 4294966912 }
  0x1a   :  { %394 = dma.done.wait [#allocation5], 384  }
  0x1b   :  { %395 = vsyncadd [#allocation5], 4294966912  ;;  %v400_v0 = vmov 0.0   ;;  %vm401_vm0 = vmmov 0   ;;  %vm59_vm1 = vcmask 1043456   ;;  %vm55_vm2 = vcmask 31744  }
  0x1c   :  { %323 = vmatprep.subr.mxu0 %v400_v0  ;;  %325 = vmatprep.mubr.msk.f32.mxu0 %vm401_vm0, %v400_v0  ;;  %v49_v1 = vld [vmem:[%s459_s1] sm:$0xf]  ;;  %v136_v3 = vld [vmem:[#allocation2 + $0x10] sm:$0xff]  ;;  %v135_v4 = vld [vmem:[#allocation2 + $0x8] sm:$0xff]  ;;  %vm142_vm3 = vcmask 195584   ;;  %vm298_vm4 = vcmask 15360  }
  0x1d   :  { %328 = vmatprep.subr.mxu1 %v400_v0  ;;  %334 = vmatprep.mubr.msk.f32.mxu1 %vm401_vm0, %v400_v0  ;;  %v48_v2 = vld [vmem:[%s458_s0] sm:$0xff]  ;;  %v219_v11 = vld [vmem:[#allocation4 + $0x10] sm:$0xff]  ;;  %v217_v13 = vld [vmem:[#allocation4] sm:$0xff] }
  0x1e   :  { %324 = vmatpush3.msk.msra.mxu0 %vm59_vm1, %v49_v1  ;;  %329 = vmatpush3.msra.mxu1 %v136_v3  ;;  %v134_v5 = vld [vmem:[#allocation2] sm:$0xff] }
  0x1f   :  { %326 = vmatmul.mubr.msk.f32.vlgmr.msra.gmra.mxu0 %vm55_vm2, %v48_v2  ;;  %337 = vmatprep.subr.mxu0 %v400_v0  ;;  %v306_v6 = vld [vmem:[%s462_s4] ss:$0 sm:$0xff]  ;;  %v309_v14 = vld [vmem:[%s462_s4 + $0x1] ss:$0 sm:$0xff]  ;;  %v311_v19 = vld [vmem:[%s462_s4 + $0x2] ss:$0 sm:$0xff] }
  0x20   :  { %343 = vmatprep.mubr.msk.f32.mxu0 %vm401_vm0, %v400_v0  ;;  %330 = vmatprep.subr.mxu1 %v400_v0  ;;  %v218_v12 = vld [vmem:[#allocation4 + $0x8] sm:$0xff] }
  0x21   :  { %331 = vmatpush3.msra.mxu1 %v135_v4  ;;  %338 = vmatpush3.msra.mxu0 %v219_v11 }
  0x22   :  { %332 = vmatprep.subr.mxu1 %v400_v0  ;;  %339 = vmatprep.subr.mxu0 %v400_v0 }
  0x23   :  { %333 = vmatpush3.msra.mxu1 %v134_v5  ;;  %340 = vmatpush3.msra.mxu0 %v218_v12 }
  0x24   :  { %341 = vmatprep.subr.mxu0 %v400_v0 }
  0x25   :  { %342 = vmatpush3.msra.mxu0 %v217_v13 }
  0xdf   :  { %v129_v7 = vpop.f32.mrf.mxu0 }
  0xe0   :  { %v130_v8 = vadd.f32 %v306_v6, %v129_v7 }
  0xe1   :  { %v327_v9 = vpop.f32.mrf.mxu0 }
  0xe2   :  { %v133_v10 = vmax.f32 %v130_v8, 0.0 }
  0xe4   :  { %335 = vmatmul.mubr.msk.f32.vlgmr.msra.gmra.mxu1 %vm142_vm3, %v133_v10 }
 0x1a4   :  { %v212_v15 = vpop.f32.mrf.mxu1 }
 0x1a5   :  { %v213_v16 = vadd.f32 %v309_v14, %v212_v15 }
 0x1a6   :  { %v336_v17 = vpop.f32.mrf.mxu1 }
 0x1a7   :  { %v216_v18 = vmax.f32 %v213_v16, 0.0 }
 0x1a9   :  { %344 = vmatmul.mubr.msk.f32.vlgmr.msra.gmra.mxu0 %vm142_vm3, %v216_v18 }
 0x269   :  { %v294_v20 = vpop.f32.mrf.mxu0 }
 0x26a   :  { %v295_v21 = vadd.f32 %v311_v19, %v294_v20 }
 0x26b   :  { %v345_v22 = vpop.f32.mrf.mxu0 }
 0x26c   :  { %299 = vst.msk [vmem:[%s463_s5] sm:$0xff] %vm298_vm4, %v295_v21 }
 0x26d   :  { %304 = vsyncpa [#allocation3], 1 }
 0x26e   :  { %305 = vsyncpa [#allocation5], 1 }

</bundles_post_ra>
